<compile_context>
chip_gen: v6e
topology: v6e:2x2x1
jax: 0.10.0
libtpu: 0.0.40
codegen_flags: <defaults>
</compile_context>

<pallas_src>
import functools

import jax
import jax.numpy as jnp
from jax import lax
from jax.experimental import pallas as pl
from jax.experimental.pallas import tpu as pltpu


# ----------------------------- Pallas kernel ------------------------------ #

def _gru_recurrent_kernel(gi_ref, whh_ref, bhn_ref, out_ref, h_ref, *, tc):
    """Recurrent GRU math for one direction over one chunk of `tc` timesteps.

    grid = (num_dirs ["parallel"], T//tc ["arbitrary"])

    gi_ref  : (1, 3, tc, B, H) precomputed input projections, gate-major
              (gate order r, z, n; b_ih and b_hh[r], b_hh[z] already folded in)
    whh_ref : (1, 3, H, H)     W_hh^T per gate for this direction
    bhn_ref : (1, 1, H)        b_hh of the 'n' gate
    out_ref : (1, tc, B, H)    per-timestep hidden states for this chunk
    h_ref   : (num_dirs, B, H) VMEM scratch carrying the recurrent state
    """
    d = pl.program_id(0)
    t_chunk = pl.program_id(1)

    @pl.when(t_chunk == 0)
    def _():
        h_ref[d] = jnp.zeros(h_ref.shape[1:], h_ref.dtype)

    # Gate-major weight layout: leading-dim indexing, no intra-tile lane slices.
    whh_r = whh_ref[0, 0]
    whh_z = whh_ref[0, 1]
    whh_n = whh_ref[0, 2]
    b_hn = bhn_ref[0]                      # (1, H)

    def step(tt, h):
        i_r = gi_ref[0, 0, tt]             # (B, H)
        i_z = gi_ref[0, 1, tt]
        i_n = gi_ref[0, 2, tt]
        r = jax.nn.sigmoid(
            i_r + jnp.dot(h, whh_r, preferred_element_type=jnp.float32))
        z = jax.nn.sigmoid(
            i_z + jnp.dot(h, whh_z, preferred_element_type=jnp.float32))
        n = jnp.tanh(
            i_n + r * (jnp.dot(h, whh_n, preferred_element_type=jnp.float32)
                       + b_hn))
        h_new = (1.0 - z) * n + z * h
        out_ref[0, tt] = h_new.astype(out_ref.dtype)
        return h_new

    h_ref[d] = lax.fori_loop(0, tc, step, h_ref[d], unroll=True)


def gru_layer(gi, whh, bhn, *, tc):
    """Run the recurrent pass for all directions of one GRU layer.

    gi  : (num_dirs, 3, Tp, B, H)  (backward direction already time-reversed)
    whh : (num_dirs, 3, H, H)
    bhn : (num_dirs, 1, H)
    Returns (num_dirs, Tp, B, H); backward direction in reversed time order.
    """
    nd, _, tp, b, h = gi.shape
    n_chunks = tp // tc
    return pl.pallas_call(
        functools.partial(_gru_recurrent_kernel, tc=tc),
        out_shape=jax.ShapeDtypeStruct((nd, tp, b, h), jnp.float32),
        grid_spec=pltpu.PrefetchScalarGridSpec(
            num_scalar_prefetch=0,
            grid=(nd, n_chunks),
            in_specs=[
                pl.BlockSpec((1, 3, tc, b, h), lambda d, t: (d, 0, t, 0, 0)),
                pl.BlockSpec((1, 3, h, h), lambda d, t: (d, 0, 0, 0)),
                pl.BlockSpec((1, 1, h), lambda d, t: (d, 0, 0)),
            ],
            out_specs=pl.BlockSpec((1, tc, b, h), lambda d, t: (d, t, 0, 0)),
            scratch_shapes=[pltpu.VMEM((nd, b, h), jnp.float32)],
        ),
        compiler_params=pltpu.CompilerParams(
            dimension_semantics=("parallel", "arbitrary")),
    )(gi, whh, bhn)


# ------------------------------ Encoder glue ------------------------------ #

def init_encoder_params(key, vocab_len, embedding_size, gru_hidden_size,
                        gru_layers, bidirectional):
    """PyTorch-style init; weights stored pre-transposed & gate-major for the kernel."""
    num_dirs = 2 if bidirectional else 1
    hid = gru_hidden_size
    k_emb, k_gru = jax.random.split(key)
    params = {
        "embedding": jax.random.normal(
            k_emb, (vocab_len, embedding_size), jnp.float32),
        "gru": [],
    }
    bound = 1.0 / float(hid) ** 0.5
    keys = jax.random.split(k_gru, gru_layers * num_dirs * 4).reshape(
        gru_layers, num_dirs, 4, 2)
    for layer in range(gru_layers):
        in_size = embedding_size if layer == 0 else hid * num_dirs
        wih_g, whh_g, bi_g, bhn = [], [], [], []
        for d in range(num_dirs):
            ks = keys[layer, d]
            w_ih = jax.random.uniform(ks[0], (3 * hid, in_size),
                                      jnp.float32, -bound, bound)
            w_hh = jax.random.uniform(ks[1], (3 * hid, hid),
                                      jnp.float32, -bound, bound)
            b_ih = jax.random.uniform(ks[2], (3 * hid,),
                                      jnp.float32, -bound, bound)
            b_hh = jax.random.uniform(ks[3], (3 * hid,),
                                      jnp.float32, -bound, bound)
            # gate-major + pre-transposed, done once at init (not per forward)
            wih_g.append(jnp.transpose(w_ih.reshape(3, hid, in_size), (0, 2, 1)))
            whh_g.append(jnp.transpose(w_hh.reshape(3, hid, hid), (0, 2, 1)))
            b_ih3 = b_ih.reshape(3, hid)
            b_hh3 = b_hh.reshape(3, hid)
            # fold b_ih (all gates) + b_hh[r,z] into the hoisted input projection
            bi_g.append(b_ih3 + b_hh3.at[2].set(0.0))
            bhn.append(b_hh3[2:3])          # b_hh of the 'n' gate, kept in-kernel
        params["gru"].append({
            "wih_g": jnp.stack(wih_g),      # (nd, 3, I, H)
            "whh_g": jnp.stack(whh_g),      # (nd, 3, H, H)
            "bi_g": jnp.stack(bi_g),        # (nd, 3, H)
            "bhn": jnp.stack(bhn),          # (nd, 1, H)
        })
    return params


@functools.partial(jax.jit,
                   static_argnames=("gru_layers", "bidirectional", "time_chunk"))
def encoder_forward(params, tokens, in_lengths, *, gru_layers, bidirectional,
                    time_chunk=8):
    """Mirrors Encoder.forward -> (outs, hidden).

    tokens     : (B, T) int32 token ids
    in_lengths : unused (the reference forward never applies packing)
    """
    del in_lengths  # unused, exactly as in the reference forward
    num_dirs = 2 if bidirectional else 1

    emb = jnp.take(params["embedding"], tokens, axis=0)        # (B, T, E)
    x = jnp.transpose(emb, (1, 0, 2)).astype(jnp.float32)      # (T, B, E)
    seq_len = x.shape[0]

    tc = min(time_chunk, seq_len)
    tp = pl.cdiv(seq_len, tc) * tc

    hiddens = []
    for layer in range(gru_layers):
        lp = params["gru"][layer]
        # Hoisted, time-parallel input projection: one big matmul per direction.
        gi = jnp.einsum("tbi,dgih->dgtbh", x, lp["wih_g"])      # (nd, 3, T, B, H)
        gi = gi + lp["bi_g"][:, :, None, None, :]
        if num_dirs == 2:
            # pre-reverse the backward direction so the kernel uses one
            # (forward) time index_map for both directions
            gi = jnp.stack([gi[0], jnp.flip(gi[1], axis=1)], axis=0)
        if tp != seq_len:
            gi = jnp.pad(gi, ((0, 0), (0, 0), (0, tp - seq_len), (0, 0), (0, 0)))

        out = gru_layer(gi, lp["whh_g"], lp["bhn"], tc=tc)[:, :seq_len]

        out_fwd = out[0]
        if num_dirs == 2:
            out_bwd = jnp.flip(out[1], axis=0)   # back to original time order
            x = jnp.concatenate([out_fwd, out_bwd], axis=-1)
            hiddens.extend([out_fwd[-1], out_bwd[0]])
        else:
            x = out_fwd
            hiddens.append(out_fwd[-1])

    outs = x                                     # (T, B, num_dirs*H)
    hidden = jnp.stack(hiddens, axis=0)          # (layers*num_dirs, B, H)
    return outs, hidden


# ------------------------- pure-JAX reference (test) ----------------------- #

def _gru_dir_reference(x, wih_g, whh_g, bi_g, bhn, reverse):
    seq_len, batch, _ = x.shape
    hid = whh_g.shape[-1]
    xs = x[::-1] if reverse else x
    gi = jnp.einsum("tbi,gih->tgbh", xs, wih_g) + bi_g[None, :, None, :]

    def step(h, gi_t):
        r = jax.nn.sigmoid(gi_t[0] + h @ whh_g[0])
        z = jax.nn.sigmoid(gi_t[1] + h @ whh_g[1])
        n = jnp.tanh(gi_t[2] + r * (h @ whh_g[2] + bhn))
        h_new = (1.0 - z) * n + z * h
        return h_new, h_new

    _, ys = lax.scan(step, jnp.zeros((batch, hid), jnp.float32), gi)
    return ys[::-1] if reverse else ys


def encoder_reference(params, tokens, *, gru_layers, bidirectional):
    num_dirs = 2 if bidirectional else 1
    x = jnp.transpose(params["embedding"][tokens], (1, 0, 2))
    hiddens = []
    for layer in range(gru_layers):
        lp = params["gru"][layer]
        outs_d = []
        for d in range(num_dirs):
            o = _gru_dir_reference(x, lp["wih_g"][d], lp["whh_g"][d],
                                   lp["bi_g"][d], lp["bhn"][d], reverse=(d == 1))
            outs_d.append(o)
            hiddens.append(o[-1] if d == 0 else o[0])
        x = jnp.concatenate(outs_d, axis=-1) if num_dirs == 2 else outs_d[0]
    return x, jnp.stack(hiddens, axis=0)


# ---------------------------------- main ----------------------------------- #

if __name__ == "__main__":
    # cfg-equivalent small sizes
    vocab_len = 32
    embedding_size = 16
    gru_hidden_size = 32
    gru_layers = 2
    bidirection = True

    batch, seq = 2, 8
    time_chunk = 4          # 2 time chunks per direction -> exercises state carry

    key = jax.random.PRNGKey(0)
    k_params, k_tok = jax.random.split(key)

    params = init_encoder_params(
        k_params, vocab_len, embedding_size, gru_hidden_size,
        gru_layers, bidirection)

    tokens = jax.random.randint(k_tok, (batch, seq), 0, vocab_len, jnp.int32)
    in_lengths = jnp.full((batch,), seq, jnp.int32)

    outs, hidden = encoder_forward(
        params, tokens, in_lengths,
        gru_layers=gru_layers, bidirectional=bidirection, time_chunk=time_chunk)
    jax.block_until_ready((outs, hidden))

    num_dirs = 2 if bidirection else 1
    assert outs.shape == (seq, batch, num_dirs * gru_hidden_size), outs.shape
    assert hidden.shape == (gru_layers * num_dirs, batch, gru_hidden_size), hidden.shape
    assert bool(jnp.all(jnp.isfinite(outs))) and bool(jnp.all(jnp.isfinite(hidden)))

    # numerical check against a pure-JAX scan reference
    ref_outs, ref_hidden = encoder_reference(
        params, tokens, gru_layers=gru_layers, bidirectional=bidirection)
    assert bool(jnp.allclose(outs, ref_outs, atol=1e-3, rtol=1e-3))
    assert bool(jnp.allclose(hidden, ref_hidden, atol=1e-3, rtol=1e-3))

    print("KERNEL_OK")
</pallas_src>

<mosaic_0001>
module attributes {stable_mosaic.version = 11 : i64} {
  func.func @_gru_recurrent_kernel(%arg0: i32, %arg1: i32, %arg2: memref<1x3x4x2x32xf32, #tpu.memory_space<vmem>>, %arg3: memref<1x3x32x32xf32, #tpu.memory_space<vmem>>, %arg4: memref<1x1x32xf32, #tpu.memory_space<vmem>>, %arg5: memref<1x4x2x32xf32, #tpu.memory_space<vmem>>, %arg6: memref<2x2x32xf32, #tpu.memory_space<vmem>>) attributes {dimension_semantics = [#tpu.dimension_semantics<parallel>, #tpu.dimension_semantics<arbitrary>], iteration_bounds = array<i64: 2, 2>, scalar_prefetch = 0 : i64, scratch_operands = 1 : i64, tpu.core_type = #tpu.core_type<tc>, window_params = [{transform_indices = @transform_0, window_bounds = array<i64: 1, 3, 4, 2, 32>}, {transform_indices = @transform_1, window_bounds = array<i64: 1, 3, 32, 32>}, {transform_indices = @transform_2, window_bounds = array<i64: 1, 1, 32>}, {transform_indices = @transform_3, window_bounds = array<i64: 1, 4, 2, 32>}]} {
    %c0_i32 = arith.constant 0 : i32
    %0 = arith.cmpi eq, %arg1, %c0_i32 : i32
    %1 = arith.extui %0 : i1 to i32
    %c0_i32_0 = arith.constant 0 : i32
    %2 = arith.cmpi ne, %1, %c0_i32_0 : i32
    scf.if %2 {
      %cst_101 = arith.constant 0.000000e+00 : f32
      %170 = vector.broadcast %cst_101 : f32 to vector<2x32xf32>
      %171 = arith.index_cast %arg0 : i32 to index
      %c0_102 = arith.constant 0 : index
      %c0_103 = arith.constant 0 : index
      %172 = vector.load %arg6[%171, %c0_102, %c0_103] : memref<2x2x32xf32, #tpu.memory_space<vmem>>, vector<1x2x32xf32>
      %173 = vector.shape_cast %172 : vector<1x2x32xf32> to vector<2x32xf32>
      %174 = vector.shape_cast %170 : vector<2x32xf32> to vector<1x2x32xf32>
      tpu.vector_store %arg6[%171, %c0_102, %c0_103], %174 {strides = array<i32>} : memref<2x2x32xf32, #tpu.memory_space<vmem>>, vector<1x2x32xf32>,
    } else {
    }
    %c0 = arith.constant 0 : index
    %c0_1 = arith.constant 0 : index
    %c0_2 = arith.constant 0 : index
    %c0_3 = arith.constant 0 : index
    %3 = vector.load %arg3[%c0, %c0_1, %c0_2, %c0_3] : memref<1x3x32x32xf32, #tpu.memory_space<vmem>>, vector<1x1x32x32xf32>
    %4 = vector.shape_cast %3 : vector<1x1x32x32xf32> to vector<32x32xf32>
    %c0_4 = arith.constant 0 : index
    %c1 = arith.constant 1 : index
    %c0_5 = arith.constant 0 : index
    %c0_6 = arith.constant 0 : index
    %5 = vector.load %arg3[%c0_4, %c1, %c0_5, %c0_6] : memref<1x3x32x32xf32, #tpu.memory_space<vmem>>, vector<1x1x32x32xf32>
    %6 = vector.shape_cast %5 : vector<1x1x32x32xf32> to vector<32x32xf32>
    %c0_7 = arith.constant 0 : index
    %c2 = arith.constant 2 : index
    %c0_8 = arith.constant 0 : index
    %c0_9 = arith.constant 0 : index
    %7 = vector.load %arg3[%c0_7, %c2, %c0_8, %c0_9] : memref<1x3x32x32xf32, #tpu.memory_space<vmem>>, vector<1x1x32x32xf32>
    %8 = vector.shape_cast %7 : vector<1x1x32x32xf32> to vector<32x32xf32>
    %c0_10 = arith.constant 0 : index
    %c0_11 = arith.constant 0 : index
    %c0_12 = arith.constant 0 : index
    %9 = vector.load %arg4[%c0_10, %c0_11, %c0_12] : memref<1x1x32xf32, #tpu.memory_space<vmem>>, vector<1x1x32xf32>
    %10 = vector.shape_cast %9 : vector<1x1x32xf32> to vector<1x32xf32>
    %11 = arith.index_cast %arg0 : i32 to index
    %c0_13 = arith.constant 0 : index
    %c0_14 = arith.constant 0 : index
    %12 = vector.load %arg6[%11, %c0_13, %c0_14] : memref<2x2x32xf32, #tpu.memory_space<vmem>>, vector<1x2x32xf32>
    %13 = vector.shape_cast %12 : vector<1x2x32xf32> to vector<2x32xf32>
    %c0_i32_15 = arith.constant 0 : i32
    %c0_16 = arith.constant 0 : index
    %c0_17 = arith.constant 0 : index
    %14 = arith.index_cast %c0_i32_15 : i32 to index
    %c0_18 = arith.constant 0 : index
    %c0_19 = arith.constant 0 : index
    %15 = vector.load %arg2[%c0_16, %c0_17, %14, %c0_18, %c0_19] : memref<1x3x4x2x32xf32, #tpu.memory_space<vmem>>, vector<1x1x1x2x32xf32>
    %16 = vector.shape_cast %15 : vector<1x1x1x2x32xf32> to vector<2x32xf32>
    %c0_20 = arith.constant 0 : index
    %c1_21 = arith.constant 1 : index
    %17 = arith.index_cast %c0_i32_15 : i32 to index
    %c0_22 = arith.constant 0 : index
    %c0_23 = arith.constant 0 : index
    %18 = vector.load %arg2[%c0_20, %c1_21, %17, %c0_22, %c0_23] : memref<1x3x4x2x32xf32, #tpu.memory_space<vmem>>, vector<1x1x1x2x32xf32>
    %19 = vector.shape_cast %18 : vector<1x1x1x2x32xf32> to vector<2x32xf32>
    %c0_24 = arith.constant 0 : index
    %c2_25 = arith.constant 2 : index
    %20 = arith.index_cast %c0_i32_15 : i32 to index
    %c0_26 = arith.constant 0 : index
    %c0_27 = arith.constant 0 : index
    %21 = vector.load %arg2[%c0_24, %c2_25, %20, %c0_26, %c0_27] : memref<1x3x4x2x32xf32, #tpu.memory_space<vmem>>, vector<1x1x1x2x32xf32>
    %22 = vector.shape_cast %21 : vector<1x1x1x2x32xf32> to vector<2x32xf32>
    %cst = arith.constant dense<0.000000e+00> : vector<2x32xf32>
    %23 = tpu.matmul %13, %4, %cst {dimension_numbers = #tpu.dot_dimension_numbers<[1], [0], [0], [1], [0, 0, 1, 1], [], []>} : vector<2x32xf32>, vector<32x32xf32>, vector<2x32xf32> -> vector<2x32xf32>
    %24 = arith.addf %16, %23 : vector<2x32xf32>
    %25 = arith.negf %24 : vector<2x32xf32>
    %26 = math.exp %25 : vector<2x32xf32>
    %cst_28 = arith.constant 1.000000e+00 : f32
    %27 = vector.broadcast %cst_28 : f32 to vector<2x32xf32>
    %28 = arith.addf %27, %26 : vector<2x32xf32>
    %29 = arith.divf %27, %28 : vector<2x32xf32>
    %cst_29 = arith.constant dense<0.000000e+00> : vector<2x32xf32>
    %30 = tpu.matmul %13, %6, %cst_29 {dimension_numbers = #tpu.dot_dimension_numbers<[1], [0], [0], [1], [0, 0, 1, 1], [], []>} : vector<2x32xf32>, vector<32x32xf32>, vector<2x32xf32> -> vector<2x32xf32>
    %31 = arith.addf %19, %30 : vector<2x32xf32>
    %32 = arith.negf %31 : vector<2x32xf32>
    %33 = math.exp %32 : vector<2x32xf32>
    %cst_30 = arith.constant 1.000000e+00 : f32
    %34 = vector.broadcast %cst_30 : f32 to vector<2x32xf32>
    %35 = arith.addf %34, %33 : vector<2x32xf32>
    %36 = arith.divf %34, %35 : vector<2x32xf32>
    %cst_31 = arith.constant dense<0.000000e+00> : vector<2x32xf32>
    %37 = tpu.matmul %13, %8, %cst_31 {dimension_numbers = #tpu.dot_dimension_numbers<[1], [0], [0], [1], [0, 0, 1, 1], [], []>} : vector<2x32xf32>, vector<32x32xf32>, vector<2x32xf32> -> vector<2x32xf32>
    %38 = vector.broadcast %10 : vector<1x32xf32> to vector<2x32xf32>
    %39 = arith.addf %37, %38 : vector<2x32xf32>
    %40 = arith.mulf %29, %39 : vector<2x32xf32>
    %41 = arith.addf %22, %40 : vector<2x32xf32>
    %42 = math.tanh %41 : vector<2x32xf32>
    %cst_32 = arith.constant 1.000000e+00 : f32
    %43 = vector.broadcast %cst_32 : f32 to vector<2x32xf32>
    %44 = arith.subf %43, %36 : vector<2x32xf32>
    %45 = arith.mulf %44, %42 : vector<2x32xf32>
    %46 = arith.mulf %36, %13 : vector<2x32xf32>
    %47 = arith.addf %45, %46 : vector<2x32xf32>
    %c0_33 = arith.constant 0 : index
    %48 = arith.index_cast %c0_i32_15 : i32 to index
    %c0_34 = arith.constant 0 : index
    %c0_35 = arith.constant 0 : index
    %49 = vector.load %arg5[%c0_33, %48, %c0_34, %c0_35] : memref<1x4x2x32xf32, #tpu.memory_space<vmem>>, vector<1x1x2x32xf32>
    %50 = vector.shape_cast %49 : vector<1x1x2x32xf32> to vector<2x32xf32>
    %51 = vector.shape_cast %47 : vector<2x32xf32> to vector<1x1x2x32xf32>
    tpu.vector_store %arg5[%c0_33, %48, %c0_34, %c0_35], %51 {strides = array<i32>} : memref<1x4x2x32xf32, #tpu.memory_space<vmem>>, vector<1x1x2x32xf32>,
    %c1_i32 = arith.constant 1 : i32
    %c0_36 = arith.constant 0 : index
    %c0_37 = arith.constant 0 : index
    %52 = arith.index_cast %c1_i32 : i32 to index
    %c0_38 = arith.constant 0 : index
    %c0_39 = arith.constant 0 : index
    %53 = vector.load %arg2[%c0_36, %c0_37, %52, %c0_38, %c0_39] : memref<1x3x4x2x32xf32, #tpu.memory_space<vmem>>, vector<1x1x1x2x32xf32>
    %54 = vector.shape_cast %53 : vector<1x1x1x2x32xf32> to vector<2x32xf32>
    %c0_40 = arith.constant 0 : index
    %c1_41 = arith.constant 1 : index
    %55 = arith.index_cast %c1_i32 : i32 to index
    %c0_42 = arith.constant 0 : index
    %c0_43 = arith.constant 0 : index
    %56 = vector.load %arg2[%c0_40, %c1_41, %55, %c0_42, %c0_43] : memref<1x3x4x2x32xf32, #tpu.memory_space<vmem>>, vector<1x1x1x2x32xf32>
    %57 = vector.shape_cast %56 : vector<1x1x1x2x32xf32> to vector<2x32xf32>
    %c0_44 = arith.constant 0 : index
    %c2_45 = arith.constant 2 : index
    %58 = arith.index_cast %c1_i32 : i32 to index
    %c0_46 = arith.constant 0 : index
    %c0_47 = arith.constant 0 : index
    %59 = vector.load %arg2[%c0_44, %c2_45, %58, %c0_46, %c0_47] : memref<1x3x4x2x32xf32, #tpu.memory_space<vmem>>, vector<1x1x1x2x32xf32>
    %60 = vector.shape_cast %59 : vector<1x1x1x2x32xf32> to vector<2x32xf32>
    %cst_48 = arith.constant dense<0.000000e+00> : vector<2x32xf32>
    %61 = tpu.matmul %47, %4, %cst_48 {dimension_numbers = #tpu.dot_dimension_numbers<[1], [0], [0], [1], [0, 0, 1, 1], [], []>} : vector<2x32xf32>, vector<32x32xf32>, vector<2x32xf32> -> vector<2x32xf32>
    %62 = arith.addf %54, %61 : vector<2x32xf32>
    %63 = arith.negf %62 : vector<2x32xf32>
    %64 = math.exp %63 : vector<2x32xf32>
    %cst_49 = arith.constant 1.000000e+00 : f32
    %65 = vector.broadcast %cst_49 : f32 to vector<2x32xf32>
    %66 = arith.addf %65, %64 : vector<2x32xf32>
    %67 = arith.divf %65, %66 : vector<2x32xf32>
    %cst_50 = arith.constant dense<0.000000e+00> : vector<2x32xf32>
    %68 = tpu.matmul %47, %6, %cst_50 {dimension_numbers = #tpu.dot_dimension_numbers<[1], [0], [0], [1], [0, 0, 1, 1], [], []>} : vector<2x32xf32>, vector<32x32xf32>, vector<2x32xf32> -> vector<2x32xf32>
    %69 = arith.addf %57, %68 : vector<2x32xf32>
    %70 = arith.negf %69 : vector<2x32xf32>
    %71 = math.exp %70 : vector<2x32xf32>
    %cst_51 = arith.constant 1.000000e+00 : f32
    %72 = vector.broadcast %cst_51 : f32 to vector<2x32xf32>
    %73 = arith.addf %72, %71 : vector<2x32xf32>
    %74 = arith.divf %72, %73 : vector<2x32xf32>
    %cst_52 = arith.constant dense<0.000000e+00> : vector<2x32xf32>
    %75 = tpu.matmul %47, %8, %cst_52 {dimension_numbers = #tpu.dot_dimension_numbers<[1], [0], [0], [1], [0, 0, 1, 1], [], []>} : vector<2x32xf32>, vector<32x32xf32>, vector<2x32xf32> -> vector<2x32xf32>
    %76 = vector.broadcast %10 : vector<1x32xf32> to vector<2x32xf32>
    %77 = arith.addf %75, %76 : vector<2x32xf32>
    %78 = arith.mulf %67, %77 : vector<2x32xf32>
    %79 = arith.addf %60, %78 : vector<2x32xf32>
    %80 = math.tanh %79 : vector<2x32xf32>
    %cst_53 = arith.constant 1.000000e+00 : f32
    %81 = vector.broadcast %cst_53 : f32 to vector<2x32xf32>
    %82 = arith.subf %81, %74 : vector<2x32xf32>
    %83 = arith.mulf %82, %80 : vector<2x32xf32>
    %84 = arith.mulf %74, %47 : vector<2x32xf32>
    %85 = arith.addf %83, %84 : vector<2x32xf32>
    %c0_54 = arith.constant 0 : index
    %86 = arith.index_cast %c1_i32 : i32 to index
    %c0_55 = arith.constant 0 : index
    %c0_56 = arith.constant 0 : index
    %87 = vector.load %arg5[%c0_54, %86, %c0_55, %c0_56] : memref<1x4x2x32xf32, #tpu.memory_space<vmem>>, vector<1x1x2x32xf32>
    %88 = vector.shape_cast %87 : vector<1x1x2x32xf32> to vector<2x32xf32>
    %89 = vector.shape_cast %85 : vector<2x32xf32> to vector<1x1x2x32xf32>
    tpu.vector_store %arg5[%c0_54, %86, %c0_55, %c0_56], %89 {strides = array<i32>} : memref<1x4x2x32xf32, #tpu.memory_space<vmem>>, vector<1x1x2x32xf32>,
    %c2_i32 = arith.constant 2 : i32
    %c0_57 = arith.constant 0 : index
    %c0_58 = arith.constant 0 : index
    %90 = arith.index_cast %c2_i32 : i32 to index
    %c0_59 = arith.constant 0 : index
    %c0_60 = arith.constant 0 : index
    %91 = vector.load %arg2[%c0_57, %c0_58, %90, %c0_59, %c0_60] : memref<1x3x4x2x32xf32, #tpu.memory_space<vmem>>, vector<1x1x1x2x32xf32>
    %92 = vector.shape_cast %91 : vector<1x1x1x2x32xf32> to vector<2x32xf32>
    %c0_61 = arith.constant 0 : index
    %c1_62 = arith.constant 1 : index
    %93 = arith.index_cast %c2_i32 : i32 to index
    %c0_63 = arith.constant 0 : index
    %c0_64 = arith.constant 0 : index
    %94 = vector.load %arg2[%c0_61, %c1_62, %93, %c0_63, %c0_64] : memref<1x3x4x2x32xf32, #tpu.memory_space<vmem>>, vector<1x1x1x2x32xf32>
    %95 = vector.shape_cast %94 : vector<1x1x1x2x32xf32> to vector<2x32xf32>
    %c0_65 = arith.constant 0 : index
    %c2_66 = arith.constant 2 : index
    %96 = arith.index_cast %c2_i32 : i32 to index
    %c0_67 = arith.constant 0 : index
    %c0_68 = arith.constant 0 : index
    %97 = vector.load %arg2[%c0_65, %c2_66, %96, %c0_67, %c0_68] : memref<1x3x4x2x32xf32, #tpu.memory_space<vmem>>, vector<1x1x1x2x32xf32>
    %98 = vector.shape_cast %97 : vector<1x1x1x2x32xf32> to vector<2x32xf32>
    %cst_69 = arith.constant dense<0.000000e+00> : vector<2x32xf32>
    %99 = tpu.matmul %85, %4, %cst_69 {dimension_numbers = #tpu.dot_dimension_numbers<[1], [0], [0], [1], [0, 0, 1, 1], [], []>} : vector<2x32xf32>, vector<32x32xf32>, vector<2x32xf32> -> vector<2x32xf32>
    %100 = arith.addf %92, %99 : vector<2x32xf32>
    %101 = arith.negf %100 : vector<2x32xf32>
    %102 = math.exp %101 : vector<2x32xf32>
    %cst_70 = arith.constant 1.000000e+00 : f32
    %103 = vector.broadcast %cst_70 : f32 to vector<2x32xf32>
    %104 = arith.addf %103, %102 : vector<2x32xf32>
    %105 = arith.divf %103, %104 : vector<2x32xf32>
    %cst_71 = arith.constant dense<0.000000e+00> : vector<2x32xf32>
    %106 = tpu.matmul %85, %6, %cst_71 {dimension_numbers = #tpu.dot_dimension_numbers<[1], [0], [0], [1], [0, 0, 1, 1], [], []>} : vector<2x32xf32>, vector<32x32xf32>, vector<2x32xf32> -> vector<2x32xf32>
    %107 = arith.addf %95, %106 : vector<2x32xf32>
    %108 = arith.negf %107 : vector<2x32xf32>
    %109 = math.exp %108 : vector<2x32xf32>
    %cst_72 = arith.constant 1.000000e+00 : f32
    %110 = vector.broadcast %cst_72 : f32 to vector<2x32xf32>
    %111 = arith.addf %110, %109 : vector<2x32xf32>
    %112 = arith.divf %110, %111 : vector<2x32xf32>
    %cst_73 = arith.constant dense<0.000000e+00> : vector<2x32xf32>
    %113 = tpu.matmul %85, %8, %cst_73 {dimension_numbers = #tpu.dot_dimension_numbers<[1], [0], [0], [1], [0, 0, 1, 1], [], []>} : vector<2x32xf32>, vector<32x32xf32>, vector<2x32xf32> -> vector<2x32xf32>
    %114 = vector.broadcast %10 : vector<1x32xf32> to vector<2x32xf32>
    %115 = arith.addf %113, %114 : vector<2x32xf32>
    %116 = arith.mulf %105, %115 : vector<2x32xf32>
    %117 = arith.addf %98, %116 : vector<2x32xf32>
    %118 = math.tanh %117 : vector<2x32xf32>
    %cst_74 = arith.constant 1.000000e+00 : f32
    %119 = vector.broadcast %cst_74 : f32 to vector<2x32xf32>
    %120 = arith.subf %119, %112 : vector<2x32xf32>
    %121 = arith.mulf %120, %118 : vector<2x32xf32>
    %122 = arith.mulf %112, %85 : vector<2x32xf32>
    %123 = arith.addf %121, %122 : vector<2x32xf32>
    %c0_75 = arith.constant 0 : index
    %124 = arith.index_cast %c2_i32 : i32 to index
    %c0_76 = arith.constant 0 : index
    %c0_77 = arith.constant 0 : index
    %125 = vector.load %arg5[%c0_75, %124, %c0_76, %c0_77] : memref<1x4x2x32xf32, #tpu.memory_space<vmem>>, vector<1x1x2x32xf32>
    %126 = vector.shape_cast %125 : vector<1x1x2x32xf32> to vector<2x32xf32>
    %127 = vector.shape_cast %123 : vector<2x32xf32> to vector<1x1x2x32xf32>
    tpu.vector_store %arg5[%c0_75, %124, %c0_76, %c0_77], %127 {strides = array<i32>} : memref<1x4x2x32xf32, #tpu.memory_space<vmem>>, vector<1x1x2x32xf32>,
    %c3_i32 = arith.constant 3 : i32
    %c0_78 = arith.constant 0 : index
    %c0_79 = arith.constant 0 : index
    %128 = arith.index_cast %c3_i32 : i32 to index
    %c0_80 = arith.constant 0 : index
    %c0_81 = arith.constant 0 : index
    %129 = vector.load %arg2[%c0_78, %c0_79, %128, %c0_80, %c0_81] : memref<1x3x4x2x32xf32, #tpu.memory_space<vmem>>, vector<1x1x1x2x32xf32>
    %130 = vector.shape_cast %129 : vector<1x1x1x2x32xf32> to vector<2x32xf32>
    %c0_82 = arith.constant 0 : index
    %c1_83 = arith.constant 1 : index
    %131 = arith.index_cast %c3_i32 : i32 to index
    %c0_84 = arith.constant 0 : index
    %c0_85 = arith.constant 0 : index
    %132 = vector.load %arg2[%c0_82, %c1_83, %131, %c0_84, %c0_85] : memref<1x3x4x2x32xf32, #tpu.memory_space<vmem>>, vector<1x1x1x2x32xf32>
    %133 = vector.shape_cast %132 : vector<1x1x1x2x32xf32> to vector<2x32xf32>
    %c0_86 = arith.constant 0 : index
    %c2_87 = arith.constant 2 : index
    %134 = arith.index_cast %c3_i32 : i32 to index
    %c0_88 = arith.constant 0 : index
    %c0_89 = arith.constant 0 : index
    %135 = vector.load %arg2[%c0_86, %c2_87, %134, %c0_88, %c0_89] : memref<1x3x4x2x32xf32, #tpu.memory_space<vmem>>, vector<1x1x1x2x32xf32>
    %136 = vector.shape_cast %135 : vector<1x1x1x2x32xf32> to vector<2x32xf32>
    %cst_90 = arith.constant dense<0.000000e+00> : vector<2x32xf32>
    %137 = tpu.matmul %123, %4, %cst_90 {dimension_numbers = #tpu.dot_dimension_numbers<[1], [0], [0], [1], [0, 0, 1, 1], [], []>} : vector<2x32xf32>, vector<32x32xf32>, vector<2x32xf32> -> vector<2x32xf32>
    %138 = arith.addf %130, %137 : vector<2x32xf32>
    %139 = arith.negf %138 : vector<2x32xf32>
    %140 = math.exp %139 : vector<2x32xf32>
    %cst_91 = arith.constant 1.000000e+00 : f32
    %141 = vector.broadcast %cst_91 : f32 to vector<2x32xf32>
    %142 = arith.addf %141, %140 : vector<2x32xf32>
    %143 = arith.divf %141, %142 : vector<2x32xf32>
    %cst_92 = arith.constant dense<0.000000e+00> : vector<2x32xf32>
    %144 = tpu.matmul %123, %6, %cst_92 {dimension_numbers = #tpu.dot_dimension_numbers<[1], [0], [0], [1], [0, 0, 1, 1], [], []>} : vector<2x32xf32>, vector<32x32xf32>, vector<2x32xf32> -> vector<2x32xf32>
    %145 = arith.addf %133, %144 : vector<2x32xf32>
    %146 = arith.negf %145 : vector<2x32xf32>
    %147 = math.exp %146 : vector<2x32xf32>
    %cst_93 = arith.constant 1.000000e+00 : f32
    %148 = vector.broadcast %cst_93 : f32 to vector<2x32xf32>
    %149 = arith.addf %148, %147 : vector<2x32xf32>
    %150 = arith.divf %148, %149 : vector<2x32xf32>
    %cst_94 = arith.constant dense<0.000000e+00> : vector<2x32xf32>
    %151 = tpu.matmul %123, %8, %cst_94 {dimension_numbers = #tpu.dot_dimension_numbers<[1], [0], [0], [1], [0, 0, 1, 1], [], []>} : vector<2x32xf32>, vector<32x32xf32>, vector<2x32xf32> -> vector<2x32xf32>
    %152 = vector.broadcast %10 : vector<1x32xf32> to vector<2x32xf32>
    %153 = arith.addf %151, %152 : vector<2x32xf32>
    %154 = arith.mulf %143, %153 : vector<2x32xf32>
    %155 = arith.addf %136, %154 : vector<2x32xf32>
    %156 = math.tanh %155 : vector<2x32xf32>
    %cst_95 = arith.constant 1.000000e+00 : f32
    %157 = vector.broadcast %cst_95 : f32 to vector<2x32xf32>
    %158 = arith.subf %157, %150 : vector<2x32xf32>
    %159 = arith.mulf %158, %156 : vector<2x32xf32>
    %160 = arith.mulf %150, %123 : vector<2x32xf32>
    %161 = arith.addf %159, %160 : vector<2x32xf32>
    %c0_96 = arith.constant 0 : index
    %162 = arith.index_cast %c3_i32 : i32 to index
    %c0_97 = arith.constant 0 : index
    %c0_98 = arith.constant 0 : index
    %163 = vector.load %arg5[%c0_96, %162, %c0_97, %c0_98] : memref<1x4x2x32xf32, #tpu.memory_space<vmem>>, vector<1x1x2x32xf32>
    %164 = vector.shape_cast %163 : vector<1x1x2x32xf32> to vector<2x32xf32>
    %165 = vector.shape_cast %161 : vector<2x32xf32> to vector<1x1x2x32xf32>
    tpu.vector_store %arg5[%c0_96, %162, %c0_97, %c0_98], %165 {strides = array<i32>} : memref<1x4x2x32xf32, #tpu.memory_space<vmem>>, vector<1x1x2x32xf32>,
    %c4_i32 = arith.constant 4 : i32
    %166 = arith.index_cast %arg0 : i32 to index
    %c0_99 = arith.constant 0 : index
    %c0_100 = arith.constant 0 : index
    %167 = vector.load %arg6[%166, %c0_99, %c0_100] : memref<2x2x32xf32, #tpu.memory_space<vmem>>, vector<1x2x32xf32>
    %168 = vector.shape_cast %167 : vector<1x2x32xf32> to vector<2x32xf32>
    %169 = vector.shape_cast %161 : vector<2x32xf32> to vector<1x2x32xf32>
    tpu.vector_store %arg6[%166, %c0_99, %c0_100], %169 {strides = array<i32>} : memref<2x2x32xf32, #tpu.memory_space<vmem>>, vector<1x2x32xf32>,
    return
  }
  func.func @transform_0(%arg0: i32, %arg1: i32) -> (i32, i32, i32, i32, i32) {
    %c0_i32 = arith.constant 0 : i32
    %c0_i32_0 = arith.constant 0 : i32
    %c0_i32_1 = arith.constant 0 : i32
    %c0_i32_2 = arith.constant 0 : i32
    return %arg0, %c0_i32, %arg1, %c0_i32_0, %c0_i32_1 : i32, i32, i32, i32, i32
  }
  func.func @transform_1(%arg0: i32, %arg1: i32) -> (i32, i32, i32, i32) {
    %c0_i32 = arith.constant 0 : i32
    %c0_i32_0 = arith.constant 0 : i32
    %c0_i32_1 = arith.constant 0 : i32
    %c0_i32_2 = arith.constant 0 : i32
    return %arg0, %c0_i32, %c0_i32_0, %c0_i32_1 : i32, i32, i32, i32
  }
  func.func @transform_2(%arg0: i32, %arg1: i32) -> (i32, i32, i32) {
    %c0_i32 = arith.constant 0 : i32
    %c0_i32_0 = arith.constant 0 : i32
    %c0_i32_1 = arith.constant 0 : i32
    return %arg0, %c0_i32, %c0_i32_0 : i32, i32, i32
  }
  func.func @transform_3(%arg0: i32, %arg1: i32) -> (i32, i32, i32, i32) {
    %c0_i32 = arith.constant 0 : i32
    %c0_i32_0 = arith.constant 0 : i32
    %c0_i32_1 = arith.constant 0 : i32
    return %arg0, %arg1, %c0_i32, %c0_i32_0 : i32, i32, i32, i32
  }
}

</mosaic_0001>

<bundles_post_ra>
// kernel: encoder_forward.2
= control target key start
LH: loop header
LB: loop body
LE: loop exit
PB: predicated region body
PF: predicated region fallthrough
CT: control target
= control target key end

     0   :  { %s1873_s12 = smov 0   ;;  %s1875_s13 = smov 0   ;;  %s2193_s0 = inlined_call_operand.vmem [shape: f32[2,3,8,2,32], index: 0, kind: input, shape index: {}]   ;;  %s2194_s1 = inlined_call_operand.vmem [shape: f32[2,3,32,32], index: 1, kind: input, shape index: {}]   ;;  %s2195_s2 = inlined_call_operand.vmem [shape: f32[2,1,32], index: 2, kind: input, shape index: {}]   ;;  %s2196_s3 = inlined_call_operand.vmem [shape: f32[2,8,2,32], index: 3, kind: output, shape index: {}]  }
   0x1   :  { %s1877_s14 = smov 0   ;;  %s1879_s15 = smov 0  }
   0x2   :  { %s1881_s16 = smov 0   ;;  %s1883_s17 = smov 0  }
   0x3   :  { %s1885_s18 = smov 0  }
   0x4 LB: > { %s22_s19 = sadd.s32 1, %s1840_s16  ;;  %s25_s20 = sadd.s32 1, %s1844_s17  ;;  %s1848_s18 = sphi %s1885_s18, %s13_s18   ;;  %s1844_s17 = sphi %s1883_s17, %s2202_s17   ;;  %s1840_s16 = sphi %s1881_s16, %s2201_s16   ;;  %s1836_s15 = sphi %s1879_s15, %s2200_s15   ;;  %s1832_s14 = sphi %s1877_s14, %s2199_s14   ;;  %s1828_s13 = sphi %s1875_s13, %s2198_s13   ;;  %s1824_s12 = sphi %s1873_s12, %s2197_s12  }
   0x5   : > { %p23_p0 = scmp.ge.s32.totalorder %s22_s19, 2  ;;  %p41_p1 = scmp.ne.s32.totalorder %s1828_s13, %s1824_s12 }
   0x6   : > { %p42_p2 = scmp.eq.s32.totalorder %s1848_s18, 0  ;;  %s34_s24 = sadd.s32 1, %s1828_s13 }
   0x7   : > { %s2204_s19 = smov (%p23_p0, %s22_s19), 0  ;;  %s2206_s20 = smov (!%p23_p0, %s25_s20), %s1844_s17 }
   0x8   : > { %p43_p3 = por %p42_p2, %p41_p1  ;;  %p27_p4 = scmp.ge.s32.totalorder %s2206_s20, 2 }
   0x9   : > { %s30_s21 = ssub.s32 %s1840_s16, %s2204_s19  ;;  %p1443_p6 = scmp.ge.s32.totalorder %s1848_s18, 4 }
   0xa   : > { %s2208_s20 = smov (%p27_p4, %s2206_s20), 0 }
   0xb   : > { %s29_s22 = ssub.s32 %s1844_s17, %s2208_s20  ;;  %147 = sbr.rel (%p1443_p6) target bundleno = 26 (0x1a), region = 16 }
   0xc   : > { %s31_s23 = sor.u32 %s30_s21, %s29_s22 }
   0xd   : > { %p32_p5 = scmp.eq.s32.totalorder %s31_s23, 0 }
   0xf   : > { %s1924_s25 = scalar_select %p32_p5, %s1828_s13, %s34_s24  }
  0x10   : > { %150 = sbr.rel (!%p43_p3) target bundleno = 26 (0x1a), region = 20  ;;  %s152_s26 = sand.u32 (%p43_p3), 1, %s1828_s13  }
  0x11   : > { %s1691_s27 = smul.u32 (%p43_p3), 24, %s152_s26  ;;  %s1444_s28 = sshll.u32 (%p43_p3), %s1840_s16, 2 }
  0x12   : > { %s1692_s29 = smul.u32 (%p43_p3), 24, %s1844_s17 }
  0x13   : > { %s154_s8 = scalar_lea.vmem (%p43_p3), [#allocation3], %s1691_s27 }
  0x14   : > { %s157_s30 = sadd.s32 (%p43_p3), %s1692_s29, %s1444_s28 }
  0x15   : > { %s1445_s4 = sshll.u32 %s157_s30, 1 }
  0x16   : > { %s159_s7 = scalar_lea.vmem %s2193_s0, %s1445_s4 }
  0x17   : > { %v176_v0 = vld [vmem:[%s159_s7] sm:$0xff]   ;;  %v184_v1 = vld [vmem:[%s159_s7 + $0x10] sm:$0xff]  }
  0x18   : > { %v192_v2 = vld [vmem:[%s159_s7 + $0x20] sm:$0xff]   ;;  %177 = vst [vmem:[%s154_s8] sm:$0xff] %v176_v0   ;;  %185 = vst [vmem:[%s154_s8 + $0x8] sm:$0xff] %v184_v1  }
  0x19   : > { %193 = vst [vmem:[%s154_s8 + $0x10] sm:$0xff] %v192_v2  }
  0x1a PF: > { %p1446_p7 = scmp.ge.s32.totalorder %s1848_s18, 1  ;;  %p260_p8 = scmp.lt.s32.totalorder %s1848_s18, 5 }
  0x1c   : > { %p261_p9 = pnand %p1446_p7, %p260_p8 }
  0x1d   : > { %s267_s9 = sand.u32 (!%p261_p9), 1, %s1824_s12   ;;  %p303_p10 = scmp.lt.s32.totalorder (!%p261_p9), %s1836_s15, 1 }
  0x1e   : > { %264 = sbr.rel (%p261_p9) target bundleno = 1051 (0x41b), region = 69  ;;  %s1448_s11 = sshll.u32 (!%p261_p9), %s1832_s14, 2 }
  0x1f   : > { %s1693_s10 = smul.u32 (!%p261_p9), 24, %s267_s9  ;;  %p314_p11 = scmp.lt.s32.totalorder (!%p261_p9), %s1448_s11, 7 }
  0x20   : > { %p1451_p12 = scmp.ne.s32.totalorder (!%p261_p9), %s1832_s14, 0 }
  0x21   : > { %s1957_s8 = scalar_lea.vmem (!%p261_p9), [#allocation3], %s1693_s10 }
  0x23   : > { %s1939_s21 = scalar_select %p303_p10, %s1836_s15, 1 }
  0x24   : > { %s2210_s11 = smov (!%p314_p11, %s1448_s11), 7  ;;  %s1452_s9 = sshll.u32 (!%p1451_p12), %s1836_s15, 1 }
  0x25   : > { %s1694_s22 = smul.u32 96, %s1939_s21  ;;  %s310_s26 = scalar_lea.vmem %s2195_s2, %s1939_s21 }
  0x26   : > { %s1449_s12 = sshll.u32 %s1939_s21, 3  ;;  %324 = sbr.rel (%p1451_p12) target bundleno = 45 (0x2d), region = 77 }
  0x27   : > { %s1949_s29 = scalar_lea.vmem %s2194_s1, %s1694_s22  ;;  %s317_s30 = sadd.s32 %s1449_s12, %s2210_s11 }
  0x28   : > { %s1450_s4 = sshll.u32 %s317_s30, 1  ;;  %s326_s23 = scalar_lea.vmem (!%p1451_p12), [#allocation2], %s1452_s9 }
  0x29   : > { %s1955_s7 = scalar_lea.vmem %s2196_s3, %s1450_s4 }
  0x2b   : > { %vm327_vm0 = vcmask 254976   ;;  %v1850_v3 = vmov 0.0  }
  0x2c   : > { %328 = vst.msk [vmem:[%s326_s23] sm:$0x3] %vm327_vm0, %v1850_v3 }
  0x2d PF: > { %v1962_v4 = vld [vmem:[%s1949_s29 + $0x18] sm:$0xff]  ;;  %s1461_s10 = sshll.u32 %s1836_s15, 1  ;;  %v1851_v5 = vmov 0.0   ;;  %v1967_v6 = vld [vmem:[%s1949_s29 + $0x10] sm:$0xff]  ;;  %vm1852_vm1 = vmmov 0   ;;  %v1981_v9 = vld [vmem:[%s1949_s29 + $0x8] sm:$0xff] }
  0x2e   : > { %1559 = vmatprep.subr.mxu0 %v1851_v5  ;;  %1567 = vmatprep.mubr.msk.f32.mxu0 %vm1852_vm1, %v1851_v5  ;;  %v1972_v7 = vld [vmem:[%s1949_s29 + $0x38] sm:$0xff]  ;;  %v1977_v8 = vld [vmem:[%s1949_s29 + $0x30] sm:$0xff]  ;;  %v1987_v10 = vld [vmem:[%s1949_s29 + $0x28] sm:$0xff]  ;;  %s1995_s14 = scalar_lea.vmem [#allocation2], %s1461_s10  ;;  %vm352_vm2 = vcmask 261120   ;;  %vm593_vm3 = vcmask 254976  }
  0x2f   : > { %1560 = vmatpush3.msra.mxu0 %v1962_v4  ;;  %1570 = vmatprep.subr.mxu1 %v1851_v5  ;;  %v1991_v11 = vld [vmem:[%s1949_s29] sm:$0xff]  ;;  %v2009_v14 = vld [vmem:[%s1949_s29 + $0x58] sm:$0xff]  ;;  %v2018_v15 = vld [vmem:[%s1949_s29 + $0x50] sm:$0xff] }
  0x30   : > { %1561 = vmatprep.subr.mxu0 %v1851_v5  ;;  %1571 = vmatpush3.msra.mxu1 %v1972_v7  ;;  %v2002_v13 = vld [vmem:[%s1949_s29 + $0x20] sm:$0xff]  ;;  %v2025_v16 = vld [vmem:[%s1949_s29 + $0x48] sm:$0xff] }
  0x31   : > { %1562 = vmatpush3.msra.mxu0 %v1967_v6  ;;  %1572 = vmatprep.subr.mxu1 %v1851_v5  ;;  %v2033_v17 = vld [vmem:[%s1949_s29 + $0x40] sm:$0xff]  ;;  %v1463_v37 = vld [vmem:[%s1957_s8 + $0x10] sm:$0x3]  ;;  %v1472_v0 = vld [vmem:[%s1957_s8 + $0x12] sm:$0x3] }
  0x32   : > { %1563 = vmatprep.subr.mxu0 %v1851_v5  ;;  %1573 = vmatpush3.msra.mxu1 %v1977_v8  ;;  %v347_v18 = vld [vmem:[%s1957_s8] sm:$0x3]  ;;  %v1462_v22 = vld [vmem:[%s1957_s8 + $0x8] sm:$0x3]  ;;  %v2068_v33 = vld [vmem:[%s310_s26] ss:$0 sm:$0xff] }
  0x33   : > { %1564 = vmatpush3.msra.mxu0 %v1981_v9  ;;  %v1998_v12 = vld [vmem:[%s1995_s14] sm:$0x3]  ;;  %1574 = vmatprep.subr.mxu1 %v1851_v5  ;;  %v1470_v46 = vld [vmem:[%s1957_s8 + $0x2] sm:$0x3]  ;;  %v1471_v53 = vld [vmem:[%s1957_s8 + $0xa] sm:$0x3] }
  0x34   : > { %1565 = vmatprep.subr.mxu0 %v1851_v5  ;;  %1575 = vmatpush3.msra.mxu1 %v1987_v10 }
  0x35   : > { %1566 = vmatpush3.msra.mxu0 %v1991_v11  ;;  %1576 = vmatprep.subr.mxu1 %v1851_v5 }
  0x36   : > { %1568 = vmatmul.mubr.msk.f32.vlgmr.msra.gmra.mxu0 %vm352_vm2, %v1998_v12  ;;  %1577 = vmatpush3.msra.mxu1 %v2002_v13 }
  0x37   : > { %1578 = vmatprep.mubr.msk.f32.mxu1 %vm1852_vm1, %v1851_v5  ;;  %1581 = vmatprep.subr.mxu0 %v1851_v5 }
  0x38   : > { %1579 = vmatmul.mubr.msk.f32.vlgmr.msra.gmra.mxu1 %vm352_vm2, %v1998_v12  ;;  %1582 = vmatpush3.msra.mxu0 %v2009_v14 }
  0x39   : > { %1583 = vmatprep.subr.mxu0 %v1851_v5  ;;  %1589 = vmatprep.mubr.msk.f32.mxu0 %vm1852_vm1, %v1851_v5 }
  0x3a   : > { %1584 = vmatpush3.msra.mxu0 %v2018_v15  ;;  %1592 = vmatprep.subr.mxu1 %v1851_v5 }
  0x3b   : > { %1585 = vmatprep.subr.mxu0 %v1851_v5  ;;  %1593 = vmatpush3.msra.mxu1 %v1962_v4 }
  0x3c   : > { %1586 = vmatpush3.msra.mxu0 %v2025_v16  ;;  %1594 = vmatprep.subr.mxu1 %v1851_v5 }
  0x3d   : > { %1587 = vmatprep.subr.mxu0 %v1851_v5  ;;  %1595 = vmatpush3.msra.mxu1 %v1967_v6 }
  0x3e   : > { %1588 = vmatpush3.msra.mxu0 %v2033_v17  ;;  %1596 = vmatprep.subr.mxu1 %v1851_v5 }
  0x3f   : > { %1590 = vmatmul.mubr.msk.f32.vlgmr.msra.gmra.mxu0 %vm352_vm2, %v1998_v12  ;;  %1603 = vmatprep.subr.mxu0 %v1851_v5 }
  0x40   : > { %1604 = vmatpush3.msra.mxu0 %v1972_v7  ;;  %1597 = vmatpush3.msra.mxu1 %v1981_v9 }
  0x41   : > { %1605 = vmatprep.subr.mxu0 %v1851_v5  ;;  %1598 = vmatprep.subr.mxu1 %v1851_v5 }
  0x42   : > { %1606 = vmatpush3.msra.mxu0 %v1977_v8  ;;  %1599 = vmatpush3.msra.mxu1 %v1991_v11 }
  0x43   : > { %1607 = vmatprep.subr.mxu0 %v1851_v5  ;;  %1600 = vmatprep.mubr.msk.f32.mxu1 %vm1852_vm1, %v1851_v5 }
  0x44   : > { %1608 = vmatpush3.msra.mxu0 %v1987_v10  ;;  %1611 = vmatprep.mubr.msk.f32.mxu0 %vm1852_vm1, %v1851_v5 }
  0x45   : > { %1609 = vmatprep.subr.mxu0 %v1851_v5  ;;  %1614 = vmatprep.subr.mxu1 %v1851_v5 }
  0x46   : > { %1610 = vmatpush3.msra.mxu0 %v2002_v13 }
  0x47   : > { %1625 = vmatprep.subr.mxu0 %v1851_v5 }
  0xf6   : > { %v422_v19 = vpop.f32.mrf.mxu0 }
  0xf7   : > { %v426_v20 = vadd.f32 %v422_v19, %v347_v18 }
  0xf8   : > { %v1569_v21 = vpop.f32.mrf.mxu0  ;;  %v499_v23 = vpop.f32.mrf.mxu1 }
  0xf9   : > { %v1465_v24 = vmul.f32 -1.442695, %v426_v20  ;;  %v503_v26 = vadd.f32 %v1462_v22, %v499_v23  ;;  %v1480_v23 = vld [vmem:[%s1957_s8 + $0xc] sm:$0x3] }
  0xfa   : > { %v1580_v25 = vpop.f32.mrf.mxu1 }
  0xfb   : > { %1754 = vpow2.f32 %v1465_v24  ;;  %v1467_v27 = vmul.f32 -1.442695, %v503_v26 }
  0xfd   : > { %1756 = vpow2.f32 %v1467_v27 }
  0xff   : > { %v582_v28 = vpop.f32.mrf.mxu0 }
 0x100   : > { %v583_v35 = vadd.f32 %v2068_v33, %v582_v28 }
 0x101   : > { %v1591_v29 = vpop.f32.mrf.mxu0 }
 0x108   : > { %v1755_v30 = vpop.eup %1754 }
 0x109   : > { %v430_v31 = vadd.f32 1.0, %v1755_v30 }
 0x10a   : > { %v1757_v32 = vpop.eup %1756 }
 0x10b   : > { %1758 = vrcp.f32 %v430_v31  ;;  %v507_v34 = vadd.f32 1.0, %v1757_v32  ;;  %v1481_v32 = vld [vmem:[%s1957_s8 + $0x14] sm:$0x3] }
 0x10d   : > { %1760 = vrcp.f32 %v507_v34 }
 0x118   : > { %v1759_v36 = vpop.eup %1758 }
 0x119   : > { %v586_v38 = vmul.f32 %v1759_v36, %v583_v35 }
 0x11a   : > { %v1761_v40 = vpop.eup %1760 }
 0x11b   : > { %v587_v39 = vadd.f32 %v1463_v37, %v586_v38  ;;  %v589_v41 = vsub.f32 1.0, %v1761_v40  ;;  %v591_v44 = vmul.f32 %v1761_v40, %v1998_v12 }
 0x11d   : > { %1762 = vtanh.f32 %v587_v39 }
 0x12a   : > { %v1763_v42 = vpop.eup %1762 }
 0x12b   : > { %v590_v43 = vmul.f32 %v1763_v42, %v589_v41  ;;  %v1488_v42 = vld [vmem:[%s1957_s8 + $0x6] sm:$0x3] }
 0x12d   : > { %v592_v45 = vadd.f32 %v591_v44, %v590_v43 }
 0x12f   : > { %594 = vst.msk [vmem:[%s1955_s7] sm:$0x3] %vm593_vm3, %v592_v45  ;;  %1601 = vmatmul.mubr.msk.f32.vlgmr.msra.gmra.mxu1 %vm352_vm2, %v592_v45  ;;  %1612 = vmatmul.mubr.msk.f32.vlgmr.msra.gmra.mxu0 %vm352_vm2, %v592_v45 }
 0x130   : > { %1615 = vmatpush3.msra.mxu1 %v2009_v14  ;;  %1622 = vmatprep.mubr.msk.f32.mxu1 %vm1852_vm1, %v1851_v5 }
 0x131   : > { %1616 = vmatprep.subr.mxu1 %v1851_v5  ;;  %1626 = vmatpush3.msra.mxu0 %v1962_v4 }
 0x132   : > { %1617 = vmatpush3.msra.mxu1 %v2018_v15  ;;  %1627 = vmatprep.subr.mxu0 %v1851_v5 }
 0x133   : > { %1618 = vmatprep.subr.mxu1 %v1851_v5  ;;  %1628 = vmatpush3.msra.mxu0 %v1967_v6 }
 0x134   : > { %1619 = vmatpush3.msra.mxu1 %v2025_v16  ;;  %1629 = vmatprep.subr.mxu0 %v1851_v5 }
 0x135   : > { %1620 = vmatprep.subr.mxu1 %v1851_v5  ;;  %1630 = vmatpush3.msra.mxu0 %v1981_v9 }
 0x136   : > { %1621 = vmatpush3.msra.mxu1 %v2033_v17  ;;  %1631 = vmatprep.subr.mxu0 %v1851_v5 }
 0x137   : > { %1623 = vmatmul.mubr.msk.f32.vlgmr.msra.gmra.mxu1 %vm352_vm2, %v592_v45  ;;  %1636 = vmatprep.subr.mxu1 %v1851_v5 }
 0x138   : > { %1637 = vmatpush3.msra.mxu1 %v1972_v7  ;;  %1632 = vmatpush3.msra.mxu0 %v1991_v11 }
 0x139   : > { %1638 = vmatprep.subr.mxu1 %v1851_v5  ;;  %1633 = vmatprep.mubr.msk.f32.mxu0 %vm1852_vm1, %v1851_v5 }
 0x13a   : > { %1639 = vmatpush3.msra.mxu1 %v1977_v8  ;;  %1644 = vmatprep.mubr.msk.f32.mxu1 %vm1852_vm1, %v1851_v5 }
 0x13b   : > { %1640 = vmatprep.subr.mxu1 %v1851_v5  ;;  %1647 = vmatprep.subr.mxu0 %v1851_v5 }
 0x13c   : > { %1641 = vmatpush3.msra.mxu1 %v1987_v10 }
 0x13d   : > { %1642 = vmatprep.subr.mxu1 %v1851_v5 }
 0x13e   : > { %1643 = vmatpush3.msra.mxu1 %v2002_v13 }
 0x13f   : > { %1658 = vmatprep.subr.mxu1 %v1851_v5 }
 0x1ef   : > { %v670_v47 = vpop.f32.mrf.mxu1  ;;  %v747_v48 = vpop.f32.mrf.mxu0 }
 0x1f0   : > { %v674_v49 = vadd.f32 %v1470_v46, %v670_v47  ;;  %v751_v54 = vadd.f32 %v1471_v53, %v747_v48  ;;  %v1489_v48 = vld [vmem:[%s1957_s8 + $0xe] sm:$0x3] }
 0x1f1   : > { %v1602_v50 = vpop.f32.mrf.mxu1  ;;  %v1613_v51 = vpop.f32.mrf.mxu0 }
 0x1f2   : > { %v1474_v52 = vmul.f32 -1.442695, %v674_v49  ;;  %v1476_v57 = vmul.f32 -1.442695, %v751_v54 }
 0x1f4   : > { %1764 = vpow2.f32 %v1474_v52 }
 0x1f5   : > { %1766 = vpow2.f32 %v1476_v57 }
 0x1f7   : > { %v824_v55 = vpop.f32.mrf.mxu1 }
 0x1f8   : > { %v825_v62 = vadd.f32 %v2068_v33, %v824_v55  ;;  %v1490_v55 = vld [vmem:[%s1957_s8 + $0x16] sm:$0x3] }
 0x1f9   : > { %v1624_v56 = vpop.f32.mrf.mxu1 }
 0x201   : > { %v1765_v58 = vpop.eup %1764 }
 0x202   : > { %v678_v59 = vadd.f32 1.0, %v1765_v58  ;;  %v1767_v60 = vpop.eup %1766 }
 0x203   : > { %v755_v61 = vadd.f32 1.0, %v1767_v60 }
 0x204   : > { %1768 = vrcp.f32 %v678_v59 }
 0x205   : > { %1770 = vrcp.f32 %v755_v61 }
 0x211   : > { %v1769_v63 = vpop.eup %1768 }
 0x212   : > { %v828_v1 = vmul.f32 %v1769_v63, %v825_v62  ;;  %v1771_v3 = vpop.eup %1770 }
 0x213   : > { %v831_v12 = vsub.f32 1.0, %v1771_v3  ;;  %v833_v20 = vmul.f32 %v1771_v3, %v592_v45 }
 0x214   : > { %v829_v2 = vadd.f32 %v1472_v0, %v828_v1 }
 0x216   : > { %1772 = vtanh.f32 %v829_v2 }
 0x223   : > { %v1773_v18 = vpop.eup %1772 }
 0x224   : > { %v832_v19 = vmul.f32 %v1773_v18, %v831_v12 }
 0x226   : > { %v834_v21 = vadd.f32 %v833_v20, %v832_v19 }
 0x228   : > { %1478 = vst.msk [vmem:[%s1955_s7 + $0x2] sm:$0x3] %vm593_vm3, %v834_v21  ;;  %1634 = vmatmul.mubr.msk.f32.vlgmr.msra.gmra.mxu0 %vm352_vm2, %v834_v21  ;;  %1645 = vmatmul.mubr.msk.f32.vlgmr.msra.gmra.mxu1 %vm352_vm2, %v834_v21 }
 0x229   : > { %1648 = vmatpush3.msra.mxu0 %v2009_v14  ;;  %1655 = vmatprep.mubr.msk.f32.mxu0 %vm1852_vm1, %v1851_v5 }
 0x22a   : > { %1649 = vmatprep.subr.mxu0 %v1851_v5  ;;  %1659 = vmatpush3.msra.mxu1 %v1962_v4  ;;  %v1479_v4 = vld [vmem:[%s1957_s8 + $0x4] sm:$0x3] }
 0x22b   : > { %1650 = vmatpush3.msra.mxu0 %v2018_v15  ;;  %1660 = vmatprep.subr.mxu1 %v1851_v5 }
 0x22c   : > { %1651 = vmatprep.subr.mxu0 %v1851_v5  ;;  %1661 = vmatpush3.msra.mxu1 %v1967_v6 }
 0x22d   : > { %1652 = vmatpush3.msra.mxu0 %v2025_v16  ;;  %1662 = vmatprep.subr.mxu1 %v1851_v5 }
 0x22e   : > { %1653 = vmatprep.subr.mxu0 %v1851_v5  ;;  %1663 = vmatpush3.msra.mxu1 %v1981_v9 }
 0x22f   : > { %1654 = vmatpush3.msra.mxu0 %v2033_v17  ;;  %1664 = vmatprep.subr.mxu1 %v1851_v5 }
 0x230   : > { %1656 = vmatmul.mubr.msk.f32.vlgmr.msra.gmra.mxu0 %vm352_vm2, %v834_v21  ;;  %1669 = vmatprep.subr.mxu0 %v1851_v5 }
 0x231   : > { %1670 = vmatpush3.msra.mxu0 %v1972_v7  ;;  %1665 = vmatpush3.msra.mxu1 %v1991_v11 }
 0x232   : > { %1671 = vmatprep.subr.mxu0 %v1851_v5  ;;  %1666 = vmatprep.mubr.msk.f32.mxu1 %vm1852_vm1, %v1851_v5 }
 0x233   : > { %1672 = vmatpush3.msra.mxu0 %v1977_v8  ;;  %1677 = vmatprep.mubr.msk.f32.mxu0 %vm1852_vm1, %v1851_v5 }
 0x234   : > { %1673 = vmatprep.subr.mxu0 %v1851_v5  ;;  %1680 = vmatprep.subr.mxu1 %v1851_v5 }
 0x235   : > { %1674 = vmatpush3.msra.mxu0 %v1987_v10 }
 0x236   : > { %1675 = vmatprep.subr.mxu0 %v1851_v5 }
 0x237   : > { %1676 = vmatpush3.msra.mxu0 %v2002_v13 }
 0x2e8   : > { %v912_v6 = vpop.f32.mrf.mxu0  ;;  %v989_v7 = vpop.f32.mrf.mxu1 }
 0x2e9   : > { %v916_v9 = vadd.f32 %v1479_v4, %v912_v6  ;;  %v993_v24 = vadd.f32 %v1480_v23, %v989_v7 }
 0x2ea   : > { %v1635_v11 = vpop.f32.mrf.mxu0  ;;  %v1646_v22 = vpop.f32.mrf.mxu1 }
 0x2eb   : > { %v1483_v8 = vmul.f32 -1.442695, %v916_v9  ;;  %v1485_v27 = vmul.f32 -1.442695, %v993_v24 }
 0x2ed   : > { %1774 = vpow2.f32 %v1483_v8 }
 0x2ee   : > { %1776 = vpow2.f32 %v1485_v27 }
 0x2f0   : > { %v1066_v25 = vpop.f32.mrf.mxu0 }
 0x2f1   : > { %v1067_v30 = vadd.f32 %v2068_v33, %v1066_v25 }
 0x2f2   : > { %v1657_v26 = vpop.f32.mrf.mxu0 }
 0x2fa   : > { %v1775_v10 = vpop.eup %1774 }
 0x2fb   : > { %v920_v28 = vadd.f32 1.0, %v1775_v10  ;;  %v1777_v13 = vpop.eup %1776 }
 0x2fc   : > { %v997_v29 = vadd.f32 1.0, %v1777_v13 }
 0x2fd   : > { %1778 = vrcp.f32 %v920_v28 }
 0x2fe   : > { %1780 = vrcp.f32 %v997_v29 }
 0x30a   : > { %v1779_v31 = vpop.eup %1778 }
 0x30b   : > { %v1070_v34 = vmul.f32 %v1779_v31, %v1067_v30  ;;  %v1781_v36 = vpop.eup %1780 }
 0x30c   : > { %v1073_v37 = vsub.f32 1.0, %v1781_v36  ;;  %v1075_v40 = vmul.f32 %v1781_v36, %v834_v21 }
 0x30d   : > { %v1071_v35 = vadd.f32 %v1481_v32, %v1070_v34 }
 0x30f   : > { %1782 = vtanh.f32 %v1071_v35 }
 0x31c   : > { %v1783_v38 = vpop.eup %1782 }
 0x31d   : > { %v1074_v39 = vmul.f32 %v1783_v38, %v1073_v37 }
 0x31f   : > { %v1076_v41 = vadd.f32 %v1075_v40, %v1074_v39 }
 0x321   : > { %1487 = vst.msk [vmem:[%s1955_s7 + $0x4] sm:$0x3] %vm593_vm3, %v1076_v41  ;;  %1667 = vmatmul.mubr.msk.f32.vlgmr.msra.gmra.mxu1 %vm352_vm2, %v1076_v41  ;;  %1678 = vmatmul.mubr.msk.f32.vlgmr.msra.gmra.mxu0 %vm352_vm2, %v1076_v41 }
 0x322   : > { %1681 = vmatpush3.msra.mxu1 %v2009_v14  ;;  %1688 = vmatprep.mubr.msk.f32.mxu1 %vm1852_vm1, %v1851_v5 }
 0x323   : > { %1682 = vmatprep.subr.mxu1 %v1851_v5 }
 0x324   : > { %1683 = vmatpush3.msra.mxu1 %v2018_v15 }
 0x325   : > { %1684 = vmatprep.subr.mxu1 %v1851_v5 }
 0x326   : > { %1685 = vmatpush3.msra.mxu1 %v2025_v16 }
 0x327   : > { %1686 = vmatprep.subr.mxu1 %v1851_v5 }
 0x328   : > { %1687 = vmatpush3.msra.mxu1 %v2033_v17 }
 0x329   : > { %1689 = vmatmul.mubr.msk.f32.vlgmr.msra.gmra.mxu1 %vm352_vm2, %v1076_v41 }
 0x3e1   : > { %v1154_v14 = vpop.f32.mrf.mxu1  ;;  %v1231_v43 = vpop.f32.mrf.mxu0 }
 0x3e2   : > { %v1158_v44 = vadd.f32 %v1488_v42, %v1154_v14  ;;  %v1235_v15 = vadd.f32 %v1489_v48, %v1231_v43 }
 0x3e3   : > { %v1668_v45 = vpop.f32.mrf.mxu1  ;;  %v1679_v46 = vpop.f32.mrf.mxu0 }
 0x3e4   : > { %v1492_v47 = vmul.f32 -1.442695, %v1158_v44  ;;  %v1494_v16 = vmul.f32 -1.442695, %v1235_v15 }
 0x3e6   : > { %1784 = vpow2.f32 %v1492_v47 }
 0x3e7   : > { %1786 = vpow2.f32 %v1494_v16 }
 0x3e9   : > { %v1308_v49 = vpop.f32.mrf.mxu1 }
 0x3ea   : > { %v1309_v53 = vadd.f32 %v2068_v33, %v1308_v49 }
 0x3eb   : > { %v1690_v50 = vpop.f32.mrf.mxu1 }
 0x3f3   : > { %v1785_v5 = vpop.eup %1784 }
 0x3f4   : > { %v1162_v51 = vadd.f32 1.0, %v1785_v5  ;;  %v1787_v17 = vpop.eup %1786 }
 0x3f5   : > { %v1239_v52 = vadd.f32 1.0, %v1787_v17 }
 0x3f6   : > { %1788 = vrcp.f32 %v1162_v51 }
 0x3f7   : > { %1790 = vrcp.f32 %v1239_v52 }
 0x403   : > { %v1789_v54 = vpop.eup %1788 }
 0x404   : > { %v1312_v56 = vmul.f32 %v1789_v54, %v1309_v53  ;;  %v1791_v58 = vpop.eup %1790 }
 0x405   : > { %v1315_v59 = vsub.f32 1.0, %v1791_v58  ;;  %v1317_v61 = vmul.f32 %v1791_v58, %v1076_v41 }
 0x406   : > { %v1313_v57 = vadd.f32 %v1490_v55, %v1312_v56 }
 0x408   : > { %1792 = vtanh.f32 %v1313_v57 }
 0x415   : > { %v1793_v60 = vpop.eup %1792 }
 0x416   : > { %v1316_v62 = vmul.f32 %v1793_v60, %v1315_v59 }
 0x418   : > { %v1318_v63 = vadd.f32 %v1317_v61, %v1316_v62 }
 0x41a   : > { %1496 = vst.msk [vmem:[%s1955_s7 + $0x6] sm:$0x3] %vm593_vm3, %v1318_v63  ;;  %1321 = vst.msk [vmem:[%s1995_s14] sm:$0x3] %vm593_vm3, %v1318_v63 }
 0x41b PF: > { %s13_s18 = sadd.s32 1, %s1848_s18   ;;  %s2197_s12 = smov %s1828_s13 }
 0x41c   : > { %p10_p13 = scmp.ge.s32.totalorder %s13_s18, 6   ;;  %s2198_s13 = smov %s1924_s25 }
 0x41d   : > { %s2199_s14 = smov %s1840_s16  ;;  %s2200_s15 = smov %s1844_s17 }
 0x41e   : > { %s2201_s16 = smov %s2204_s19  ;;  %s2202_s17 = smov %s2208_s20 }
 0x41f   :  { %12 = sbr.rel (!%p10_p13) target bundleno = 4 (0x4), region = 136 }

</bundles_post_ra>
